<compile_context>
chip_gen: v6e
topology: v6e:2x2x1
jax: 0.10.0
libtpu: 0.0.40
codegen_flags: <defaults>
</compile_context>

<pallas_src>
import jax
import jax.numpy as jnp
import numpy as np
from jax.experimental import pallas as pl
from jax.experimental.pallas import tpu as pltpu

# ---- static demo configuration (module defaults, small test sizes) --------
N_STATE = 4          # n            (d_h_in == n since traj_input=False)
H_WIDTH = 32         # layer_width  (kept small for the demo)
BATCH = 8            # batch size of the example input


def diffeo_kernel(x_ref, wh_ref, wn_ref, b_ref, out_ref):
    # x_ref:  (3n, BB)  rows = [xt; xtdot; x_zero], batch on lanes
    # wh_ref: (2H+n, H) rows = [W1; W2; Wout]
    # wn_ref: (2H, n)   rows = [Win; G] with G = W1 @ Win (precomputed)
    # b_ref:  (H, 4)    cols = [b_in, b1, b2, b_out(padded)]
    n3, bb = x_ref.shape
    n = n3 // 3
    H = wh_ref.shape[1]

    def mm(a, b):
        return jnp.dot(a, b, preferred_element_type=jnp.float32)

    # ---- packed weights (constant block index -> resident across tiles) ----
    W1 = wh_ref[0:H, :]                    # (H, H)  fc_hidden1.weight
    W2 = wh_ref[H:2 * H, :]                # (H, H)  fc_hidden2.weight
    Wout = wh_ref[2 * H:2 * H + n, :]      # (n, H)  fc_out.weight
    Win = wn_ref[0:H, :]                   # (H, n)  fc_in.weight
    G = wn_ref[H:2 * H, :]                 # (H, n)  W1 @ Win
    b_in = b_ref[:, 0:1]                   # (H, 1)
    b1 = b_ref[:, 1:2]                     # (H, 1)
    b2 = b_ref[:, 2:3]                     # (H, 1)
    b_out = b_ref[0:n, 3:4]                # (n, 1)

    # ---- inputs (batch on lanes) -------------------------------------------
    xt = x_ref[0:n, :]                     # (n, BB)
    xtdot = x_ref[n:2 * n, :]              # (n, BB)
    x_zero = x_ref[2 * n:3 * n, :]         # (n, BB)

    # ---- fused MLP forward for [xt | x_zero] (lane-stacked, 2*BB columns) ---
    xz = jnp.concatenate([xt, x_zero], axis=1)      # (n, 2BB)  tiny (n rows)
    h0 = mm(Win, xz) + b_in                         # fc_in (no relu)
    h1 = jnp.maximum(mm(W1, h0) + b1, 0.0)          # relu(fc_hidden1)
    h2 = jnp.maximum(mm(W2, h1) + b2, 0.0)          # relu(fc_hidden2)

    # reference semantics: delta_k = sign(relu(fc_hidden_k(h_k))) re-applied to
    # the relu outputs; sign(relu(z)) == (z > 0).
    m1 = mm(W1, h1) + b1                            # (H, 2BB)
    m2 = mm(W2, h2) + b2                            # (H, 2BB)
    d1_t = m1[:, :bb] > 0.0                         # xt-path delta-1
    d1_z = m1[:, bb:] > 0.0                         # zero-path delta-1
    d2_t = m2[:, :bb] > 0.0                         # xt-path delta-2
    d2_z = m2[:, bb:] > 0.0                         # zero-path delta-2

    # ---- h_out = fc_out(h2) on the xt path ----------------------------------
    h_out = mm(Wout, h2[:, :bb]) + b_out            # (n, BB)

    # ---- JVP path: h_dot = Wout (d2 * (W2 (d1 * (G xtdot)))) ----------------
    jvp = jnp.where(d1_t, mm(G, xtdot), 0.0)        # (H, BB)
    jvp = jnp.where(d2_t, mm(W2, jvp), 0.0)         # (H, BB)
    h_dot = mm(Wout, jvp)                           # (n, BB)

    # ---- zero-path Jacobian column 2-norms (n static columns) ---------------
    acc = jnp.zeros((n, bb), jnp.float32)
    for j in range(n):                              # static unroll, n == 4
        c = jnp.where(d1_z, G[:, j:j + 1], 0.0)     # (H, BB) col j of d1*G
        c = jnp.where(d2_z, mm(W2, c), 0.0)         # (H, BB)
        c = mm(Wout, c)                             # (n, BB) col j of Jacobian
        acc = acc + c * c
    znorm = jnp.sqrt(acc)                           # (n, BB)

    # ---- lane-dense stores: rows = [h_out; h_dot; znorm] --------------------
    out_ref[0:n, :] = h_out
    out_ref[n:2 * n, :] = h_dot
    out_ref[2 * n:3 * n, :] = znorm


def diffeomorphism_forward(x, params, *, block_b=None):
    """x: (B, 3n), columns [xt | xtdot | x_zero];
    params: (Win, b_in, W1, b1, W2, b2, Wout, b_out) in torch.nn.Linear layout
    ((out, in) weights, (1, out) or (out,) biases)."""
    Win, b_in, W1, b1, W2, b2, Wout, b_out = [
        jnp.asarray(p, jnp.float32) for p in params]
    x = jnp.asarray(x, jnp.float32)
    B, three_n = x.shape
    n = three_n // 3
    H = Win.shape[0]

    # ---- weight-only precompute / packing (plain XLA, outside the kernel) ---
    G = W1 @ Win                                         # (H, n)
    Wh = jnp.concatenate([W1, W2, Wout], axis=0)         # (2H+n, H)
    Wn = jnp.concatenate([Win, G], axis=0)               # (2H, n)
    bout_pad = jnp.zeros((H,), jnp.float32).at[:n].set(b_out.reshape(-1))
    Bp = jnp.stack([b_in.reshape(-1), b1.reshape(-1), b2.reshape(-1),
                    bout_pad], axis=1)                   # (H, 4)

    # ---- batch tiling: lane-aligned (128), remainder-safe, >=2 tiles if able
    if block_b is None:
        block_b = 2048   # v6e (128 MiB VMEM) can go larger; keep <= ~4096 on v7x
    bmax = ((B + 127) // 128) * 128
    num_blocks = max(1, -(-bmax // int(block_b)))
    if num_blocks == 1 and bmax >= 256:
        num_blocks = 2                                   # feed both TCs on v7x
    block_b = ((-(-bmax // num_blocks) + 127) // 128) * 128
    B_pad = block_b * num_blocks

    # (B, 3n) -> (3n, B_pad): batch-contiguous HBM layout, zero-padded tail
    xT = x.T
    if B_pad != B:
        xT = jnp.pad(xT, ((0, 0), (0, B_pad - B)))

    yT = pl.pallas_call(
        diffeo_kernel,
        out_shape=jax.ShapeDtypeStruct((3 * n, B_pad), jnp.float32),
        grid_spec=pltpu.PrefetchScalarGridSpec(
            num_scalar_prefetch=0,
            grid=(num_blocks,),
            in_specs=[
                pl.BlockSpec((3 * n, block_b), lambda i: (0, i)),   # x^T tiles
                pl.BlockSpec(Wh.shape, lambda i: (0, 0)),           # resident W's
                pl.BlockSpec(Wn.shape, lambda i: (0, 0)),
                pl.BlockSpec(Bp.shape, lambda i: (0, 0)),
            ],
            out_specs=pl.BlockSpec((3 * n, block_b), lambda i: (0, i)),
        ),
        compiler_params=pltpu.CompilerParams(
            dimension_semantics=("parallel",)),
    )(xT, Wh, Wn, Bp)

    # (3n, B_pad) rows [h_out; h_dot; znorm] -> (B, 3n), == torch.cat(..., dim=1)
    return yT[:, :B].T


# ---------------- pure-JAX reference (mirrors the PyTorch code) -------------
def reference_forward(x, params):
    Win, b_in, W1, b1, W2, b2, Wout, b_out = params
    n = N_STATE
    xt, xtdot, x_zero = x[:, :n], x[:, n:2 * n], x[:, 2 * n:3 * n]
    B = x.shape[0]

    def lin(a, W, b):
        return a @ W.T + b

    h = [lin(xt, Win, b_in)]
    h.append(jax.nn.relu(lin(h[-1], W1, b1)))
    h.append(jax.nn.relu(lin(h[-1], W2, b2)))
    h_out = lin(h[-1], Wout, b_out)

    h_grad = jnp.broadcast_to((W1 @ Win)[None], (B, H_WIDTH, n))
    delta = jnp.sign(jax.nn.relu(lin(h[1], W1, b1)))[..., None]
    h_grad = delta * h_grad
    h_grad = jnp.einsum('ij,bjk->bik', W2, h_grad)
    delta = jnp.sign(jax.nn.relu(lin(h[2], W2, b2)))[..., None]
    h_grad = delta * h_grad
    h_grad = jnp.einsum('ij,bjk->bik', Wout, h_grad)
    h_dot = jnp.einsum('bij,bj->bi', h_grad, xtdot)

    hz = [lin(x_zero, Win, b_in)]
    hz.append(jax.nn.relu(lin(hz[-1], W1, b1)))
    hz.append(jax.nn.relu(lin(hz[-1], W2, b2)))
    hzg = jnp.broadcast_to((W1 @ Win)[None], (B, H_WIDTH, n))
    delta = jnp.sign(jax.nn.relu(lin(hz[1], W1, b1)))[..., None]
    hzg = delta * hzg
    hzg = jnp.einsum('ij,bjk->bik', W2, hzg)
    delta = jnp.sign(jax.nn.relu(lin(hz[2], W2, b2)))[..., None]
    hzg = delta * hzg
    hzg = jnp.einsum('ij,bjk->bik', Wout, hzg)[:, :, :n]
    znorm = jnp.sqrt(jnp.sum(hzg ** 2, axis=2))
    return jnp.concatenate([h_out, h_dot, znorm], axis=1)


def init_params(key):
    def linear(k, out_f, in_f):
        kw, kb = jax.random.split(k)
        bound = 1.0 / np.sqrt(in_f)
        W = jax.random.uniform(kw, (out_f, in_f), jnp.float32, -bound, bound)
        b = jax.random.uniform(kb, (1, out_f), jnp.float32, -bound, bound)
        return W, b

    k = jax.random.split(key, 4)
    Win, b_in = linear(k[0], H_WIDTH, N_STATE)
    W1, b1 = linear(k[1], H_WIDTH, H_WIDTH)
    W2, b2 = linear(k[2], H_WIDTH, H_WIDTH)
    Wout, b_out = linear(k[3], N_STATE, H_WIDTH)
    return (Win, b_in, W1, b1, W2, b2, Wout, b_out)


if __name__ == "__main__":
    key = jax.random.PRNGKey(0)
    kx, kp = jax.random.split(key)
    params = init_params(kp)
    x = jax.random.normal(kx, (BATCH, 3 * N_STATE), jnp.float32)

    fwd = jax.jit(diffeomorphism_forward)
    y = jax.block_until_ready(fwd(x, params))
    y_ref = jax.block_until_ready(reference_forward(x, params))

    assert y.shape == (BATCH, 3 * N_STATE)
    np.testing.assert_allclose(np.asarray(y), np.asarray(y_ref),
                               rtol=2e-4, atol=1e-5)
    print("KERNEL_OK")
</pallas_src>

<mosaic_0001>
module attributes {stable_mosaic.version = 11 : i64} {
  func.func @diffeo_kernel(%arg0: i32, %arg1: memref<12x128xf32, #tpu.memory_space<vmem>>, %arg2: memref<68x32xf32, #tpu.memory_space<vmem>>, %arg3: memref<64x4xf32, #tpu.memory_space<vmem>>, %arg4: memref<32x4xf32, #tpu.memory_space<vmem>>, %arg5: memref<12x128xf32, #tpu.memory_space<vmem>>) attributes {dimension_semantics = [#tpu.dimension_semantics<parallel>], iteration_bounds = array<i64: 1>, scalar_prefetch = 0 : i64, scratch_operands = 0 : i64, tpu.core_type = #tpu.core_type<tc>, window_params = [{transform_indices = @transform_0, window_bounds = array<i64: 12, 128>}, {pipeline_mode = #tpu.pipeline_mode<synchronous>, transform_indices = @transform_1, window_bounds = array<i64: 68, 32>}, {pipeline_mode = #tpu.pipeline_mode<synchronous>, transform_indices = @transform_2, window_bounds = array<i64: 64, 4>}, {pipeline_mode = #tpu.pipeline_mode<synchronous>, transform_indices = @transform_3, window_bounds = array<i64: 32, 4>}, {transform_indices = @transform_4, window_bounds = array<i64: 12, 128>}]} {
    %c0 = arith.constant 0 : index
    %c0_0 = arith.constant 0 : index
    %0 = vector.load %arg2[%c0, %c0_0] : memref<68x32xf32, #tpu.memory_space<vmem>>, vector<32x32xf32>
    %c32 = arith.constant 32 : index
    %c0_1 = arith.constant 0 : index
    %1 = vector.load %arg2[%c32, %c0_1] : memref<68x32xf32, #tpu.memory_space<vmem>>, vector<32x32xf32>
    %c64 = arith.constant 64 : index
    %c0_2 = arith.constant 0 : index
    %2 = vector.load %arg2[%c64, %c0_2] : memref<68x32xf32, #tpu.memory_space<vmem>>, vector<4x32xf32>
    %c0_3 = arith.constant 0 : index
    %c0_4 = arith.constant 0 : index
    %3 = vector.load %arg3[%c0_3, %c0_4] : memref<64x4xf32, #tpu.memory_space<vmem>>, vector<32x4xf32>
    %c32_5 = arith.constant 32 : index
    %c0_6 = arith.constant 0 : index
    %4 = vector.load %arg3[%c32_5, %c0_6] : memref<64x4xf32, #tpu.memory_space<vmem>>, vector<32x4xf32>
    %c0_7 = arith.constant 0 : index
    %c0_8 = arith.constant 0 : index
    %5 = vector.load %arg4[%c0_7, %c0_8] : memref<32x4xf32, #tpu.memory_space<vmem>>, vector<32x1xf32>
    %c0_9 = arith.constant 0 : index
    %c1 = arith.constant 1 : index
    %6 = vector.load %arg4[%c0_9, %c1] : memref<32x4xf32, #tpu.memory_space<vmem>>, vector<32x1xf32>
    %c0_10 = arith.constant 0 : index
    %c2 = arith.constant 2 : index
    %7 = vector.load %arg4[%c0_10, %c2] : memref<32x4xf32, #tpu.memory_space<vmem>>, vector<32x1xf32>
    %c0_11 = arith.constant 0 : index
    %c3 = arith.constant 3 : index
    %8 = vector.load %arg4[%c0_11, %c3] : memref<32x4xf32, #tpu.memory_space<vmem>>, vector<4x1xf32>
    %c0_12 = arith.constant 0 : index
    %c0_13 = arith.constant 0 : index
    %9 = vector.load %arg1[%c0_12, %c0_13] : memref<12x128xf32, #tpu.memory_space<vmem>>, vector<4x128xf32>
    %c4 = arith.constant 4 : index
    %c0_14 = arith.constant 0 : index
    %10 = vector.load %arg1[%c4, %c0_14] : memref<12x128xf32, #tpu.memory_space<vmem>>, vector<4x128xf32>
    %c8 = arith.constant 8 : index
    %c0_15 = arith.constant 0 : index
    %11 = vector.load %arg1[%c8, %c0_15] : memref<12x128xf32, #tpu.memory_space<vmem>>, vector<4x128xf32>
    %12 = tpu.concatenate %9, %11 in 1 : vector<4x128xf32>, vector<4x128xf32> -> vector<4x256xf32>
    %cst = arith.constant dense<0.000000e+00> : vector<32x256xf32>
    %13 = tpu.matmul %3, %12, %cst {dimension_numbers = #tpu.dot_dimension_numbers<[1], [0], [0], [1], [0, 0, 1, 1], [], []>} : vector<32x4xf32>, vector<4x256xf32>, vector<32x256xf32> -> vector<32x256xf32>
    %14 = vector.broadcast %5 : vector<32x1xf32> to vector<32x256xf32>
    %15 = arith.addf %13, %14 : vector<32x256xf32>
    %cst_16 = arith.constant dense<0.000000e+00> : vector<32x256xf32>
    %16 = tpu.matmul %0, %15, %cst_16 {dimension_numbers = #tpu.dot_dimension_numbers<[1], [0], [0], [1], [0, 0, 1, 1], [], []>} : vector<32x32xf32>, vector<32x256xf32>, vector<32x256xf32> -> vector<32x256xf32>
    %17 = vector.broadcast %6 : vector<32x1xf32> to vector<32x256xf32>
    %18 = arith.addf %16, %17 : vector<32x256xf32>
    %cst_17 = arith.constant 0.000000e+00 : f32
    %19 = vector.broadcast %cst_17 : f32 to vector<32x256xf32>
    %20 = arith.maximumf %18, %19 : vector<32x256xf32>
    %cst_18 = arith.constant dense<0.000000e+00> : vector<32x256xf32>
    %21 = tpu.matmul %1, %20, %cst_18 {dimension_numbers = #tpu.dot_dimension_numbers<[1], [0], [0], [1], [0, 0, 1, 1], [], []>} : vector<32x32xf32>, vector<32x256xf32>, vector<32x256xf32> -> vector<32x256xf32>
    %22 = vector.broadcast %7 : vector<32x1xf32> to vector<32x256xf32>
    %23 = arith.addf %21, %22 : vector<32x256xf32>
    %cst_19 = arith.constant 0.000000e+00 : f32
    %24 = vector.broadcast %cst_19 : f32 to vector<32x256xf32>
    %25 = arith.maximumf %23, %24 : vector<32x256xf32>
    %cst_20 = arith.constant dense<0.000000e+00> : vector<32x256xf32>
    %26 = tpu.matmul %0, %20, %cst_20 {dimension_numbers = #tpu.dot_dimension_numbers<[1], [0], [0], [1], [0, 0, 1, 1], [], []>} : vector<32x32xf32>, vector<32x256xf32>, vector<32x256xf32> -> vector<32x256xf32>
    %27 = vector.broadcast %6 : vector<32x1xf32> to vector<32x256xf32>
    %28 = arith.addf %26, %27 : vector<32x256xf32>
    %cst_21 = arith.constant dense<0.000000e+00> : vector<32x256xf32>
    %29 = tpu.matmul %1, %25, %cst_21 {dimension_numbers = #tpu.dot_dimension_numbers<[1], [0], [0], [1], [0, 0, 1, 1], [], []>} : vector<32x32xf32>, vector<32x256xf32>, vector<32x256xf32> -> vector<32x256xf32>
    %30 = vector.broadcast %7 : vector<32x1xf32> to vector<32x256xf32>
    %31 = arith.addf %29, %30 : vector<32x256xf32>
    %32 = vector.extract_strided_slice %28 {offsets = [0, 0], sizes = [32, 128], strides = [1, 1]} : vector<32x256xf32> to vector<32x128xf32>
    %cst_22 = arith.constant 0.000000e+00 : f32
    %33 = vector.broadcast %cst_22 : f32 to vector<32x128xf32>
    %34 = arith.cmpf ogt, %32, %33 : vector<32x128xf32>
    %35 = vector.extract_strided_slice %28 {offsets = [0, 128], sizes = [32, 128], strides = [1, 1]} : vector<32x256xf32> to vector<32x128xf32>
    %cst_23 = arith.constant 0.000000e+00 : f32
    %36 = vector.broadcast %cst_23 : f32 to vector<32x128xf32>
    %37 = arith.cmpf ogt, %35, %36 : vector<32x128xf32>
    %38 = vector.extract_strided_slice %31 {offsets = [0, 0], sizes = [32, 128], strides = [1, 1]} : vector<32x256xf32> to vector<32x128xf32>
    %cst_24 = arith.constant 0.000000e+00 : f32
    %39 = vector.broadcast %cst_24 : f32 to vector<32x128xf32>
    %40 = arith.cmpf ogt, %38, %39 : vector<32x128xf32>
    %41 = vector.extract_strided_slice %31 {offsets = [0, 128], sizes = [32, 128], strides = [1, 1]} : vector<32x256xf32> to vector<32x128xf32>
    %cst_25 = arith.constant 0.000000e+00 : f32
    %42 = vector.broadcast %cst_25 : f32 to vector<32x128xf32>
    %43 = arith.cmpf ogt, %41, %42 : vector<32x128xf32>
    %44 = vector.extract_strided_slice %25 {offsets = [0, 0], sizes = [32, 128], strides = [1, 1]} : vector<32x256xf32> to vector<32x128xf32>
    %cst_26 = arith.constant dense<0.000000e+00> : vector<4x128xf32>
    %45 = tpu.matmul %2, %44, %cst_26 {dimension_numbers = #tpu.dot_dimension_numbers<[1], [0], [0], [1], [0, 0, 1, 1], [], []>} : vector<4x32xf32>, vector<32x128xf32>, vector<4x128xf32> -> vector<4x128xf32>
    %46 = vector.broadcast %8 : vector<4x1xf32> to vector<4x128xf32>
    %47 = arith.addf %45, %46 : vector<4x128xf32>
    %cst_27 = arith.constant dense<0.000000e+00> : vector<32x128xf32>
    %48 = tpu.matmul %4, %10, %cst_27 {dimension_numbers = #tpu.dot_dimension_numbers<[1], [0], [0], [1], [0, 0, 1, 1], [], []>} : vector<32x4xf32>, vector<4x128xf32>, vector<32x128xf32> -> vector<32x128xf32>
    %cst_28 = arith.constant 0.000000e+00 : f32
    %49 = vector.broadcast %cst_28 : f32 to vector<32x128xf32>
    %50 = arith.select %34, %48, %49 : vector<32x128xi1>, vector<32x128xf32>
    %cst_29 = arith.constant dense<0.000000e+00> : vector<32x128xf32>
    %51 = tpu.matmul %1, %50, %cst_29 {dimension_numbers = #tpu.dot_dimension_numbers<[1], [0], [0], [1], [0, 0, 1, 1], [], []>} : vector<32x32xf32>, vector<32x128xf32>, vector<32x128xf32> -> vector<32x128xf32>
    %cst_30 = arith.constant 0.000000e+00 : f32
    %52 = vector.broadcast %cst_30 : f32 to vector<32x128xf32>
    %53 = arith.select %40, %51, %52 : vector<32x128xi1>, vector<32x128xf32>
    %cst_31 = arith.constant dense<0.000000e+00> : vector<4x128xf32>
    %54 = tpu.matmul %2, %53, %cst_31 {dimension_numbers = #tpu.dot_dimension_numbers<[1], [0], [0], [1], [0, 0, 1, 1], [], []>} : vector<4x32xf32>, vector<32x128xf32>, vector<4x128xf32> -> vector<4x128xf32>
    %cst_32 = arith.constant 0.000000e+00 : f32
    %55 = vector.broadcast %cst_32 : f32 to vector<4x128xf32>
    %56 = vector.extract_strided_slice %4 {offsets = [0, 0], sizes = [32, 1], strides = [1, 1]} : vector<32x4xf32> to vector<32x1xf32>
    %cst_33 = arith.constant 0.000000e+00 : f32
    %57 = vector.shape_cast %56 : vector<32x1xf32> to vector<32x1xf32>
    %58 = vector.broadcast %57 : vector<32x1xf32> to vector<32x128xf32>
    %59 = vector.broadcast %cst_33 : f32 to vector<32x128xf32>
    %60 = arith.select %37, %58, %59 : vector<32x128xi1>, vector<32x128xf32>
    %cst_34 = arith.constant dense<0.000000e+00> : vector<32x128xf32>
    %61 = tpu.matmul %1, %60, %cst_34 {dimension_numbers = #tpu.dot_dimension_numbers<[1], [0], [0], [1], [0, 0, 1, 1], [], []>} : vector<32x32xf32>, vector<32x128xf32>, vector<32x128xf32> -> vector<32x128xf32>
    %cst_35 = arith.constant 0.000000e+00 : f32
    %62 = vector.broadcast %cst_35 : f32 to vector<32x128xf32>
    %63 = arith.select %43, %61, %62 : vector<32x128xi1>, vector<32x128xf32>
    %cst_36 = arith.constant dense<0.000000e+00> : vector<4x128xf32>
    %64 = tpu.matmul %2, %63, %cst_36 {dimension_numbers = #tpu.dot_dimension_numbers<[1], [0], [0], [1], [0, 0, 1, 1], [], []>} : vector<4x32xf32>, vector<32x128xf32>, vector<4x128xf32> -> vector<4x128xf32>
    %65 = arith.mulf %64, %64 : vector<4x128xf32>
    %66 = arith.addf %55, %65 : vector<4x128xf32>
    %67 = vector.extract_strided_slice %4 {offsets = [0, 1], sizes = [32, 1], strides = [1, 1]} : vector<32x4xf32> to vector<32x1xf32>
    %cst_37 = arith.constant 0.000000e+00 : f32
    %68 = vector.shape_cast %67 : vector<32x1xf32> to vector<32x1xf32>
    %69 = vector.broadcast %68 : vector<32x1xf32> to vector<32x128xf32>
    %70 = vector.broadcast %cst_37 : f32 to vector<32x128xf32>
    %71 = arith.select %37, %69, %70 : vector<32x128xi1>, vector<32x128xf32>
    %cst_38 = arith.constant dense<0.000000e+00> : vector<32x128xf32>
    %72 = tpu.matmul %1, %71, %cst_38 {dimension_numbers = #tpu.dot_dimension_numbers<[1], [0], [0], [1], [0, 0, 1, 1], [], []>} : vector<32x32xf32>, vector<32x128xf32>, vector<32x128xf32> -> vector<32x128xf32>
    %cst_39 = arith.constant 0.000000e+00 : f32
    %73 = vector.broadcast %cst_39 : f32 to vector<32x128xf32>
    %74 = arith.select %43, %72, %73 : vector<32x128xi1>, vector<32x128xf32>
    %cst_40 = arith.constant dense<0.000000e+00> : vector<4x128xf32>
    %75 = tpu.matmul %2, %74, %cst_40 {dimension_numbers = #tpu.dot_dimension_numbers<[1], [0], [0], [1], [0, 0, 1, 1], [], []>} : vector<4x32xf32>, vector<32x128xf32>, vector<4x128xf32> -> vector<4x128xf32>
    %76 = arith.mulf %75, %75 : vector<4x128xf32>
    %77 = arith.addf %66, %76 : vector<4x128xf32>
    %78 = vector.extract_strided_slice %4 {offsets = [0, 2], sizes = [32, 1], strides = [1, 1]} : vector<32x4xf32> to vector<32x1xf32>
    %cst_41 = arith.constant 0.000000e+00 : f32
    %79 = vector.shape_cast %78 : vector<32x1xf32> to vector<32x1xf32>
    %80 = vector.broadcast %79 : vector<32x1xf32> to vector<32x128xf32>
    %81 = vector.broadcast %cst_41 : f32 to vector<32x128xf32>
    %82 = arith.select %37, %80, %81 : vector<32x128xi1>, vector<32x128xf32>
    %cst_42 = arith.constant dense<0.000000e+00> : vector<32x128xf32>
    %83 = tpu.matmul %1, %82, %cst_42 {dimension_numbers = #tpu.dot_dimension_numbers<[1], [0], [0], [1], [0, 0, 1, 1], [], []>} : vector<32x32xf32>, vector<32x128xf32>, vector<32x128xf32> -> vector<32x128xf32>
    %cst_43 = arith.constant 0.000000e+00 : f32
    %84 = vector.broadcast %cst_43 : f32 to vector<32x128xf32>
    %85 = arith.select %43, %83, %84 : vector<32x128xi1>, vector<32x128xf32>
    %cst_44 = arith.constant dense<0.000000e+00> : vector<4x128xf32>
    %86 = tpu.matmul %2, %85, %cst_44 {dimension_numbers = #tpu.dot_dimension_numbers<[1], [0], [0], [1], [0, 0, 1, 1], [], []>} : vector<4x32xf32>, vector<32x128xf32>, vector<4x128xf32> -> vector<4x128xf32>
    %87 = arith.mulf %86, %86 : vector<4x128xf32>
    %88 = arith.addf %77, %87 : vector<4x128xf32>
    %89 = vector.extract_strided_slice %4 {offsets = [0, 3], sizes = [32, 1], strides = [1, 1]} : vector<32x4xf32> to vector<32x1xf32>
    %cst_45 = arith.constant 0.000000e+00 : f32
    %90 = vector.shape_cast %89 : vector<32x1xf32> to vector<32x1xf32>
    %91 = vector.broadcast %90 : vector<32x1xf32> to vector<32x128xf32>
    %92 = vector.broadcast %cst_45 : f32 to vector<32x128xf32>
    %93 = arith.select %37, %91, %92 : vector<32x128xi1>, vector<32x128xf32>
    %cst_46 = arith.constant dense<0.000000e+00> : vector<32x128xf32>
    %94 = tpu.matmul %1, %93, %cst_46 {dimension_numbers = #tpu.dot_dimension_numbers<[1], [0], [0], [1], [0, 0, 1, 1], [], []>} : vector<32x32xf32>, vector<32x128xf32>, vector<32x128xf32> -> vector<32x128xf32>
    %cst_47 = arith.constant 0.000000e+00 : f32
    %95 = vector.broadcast %cst_47 : f32 to vector<32x128xf32>
    %96 = arith.select %43, %94, %95 : vector<32x128xi1>, vector<32x128xf32>
    %cst_48 = arith.constant dense<0.000000e+00> : vector<4x128xf32>
    %97 = tpu.matmul %2, %96, %cst_48 {dimension_numbers = #tpu.dot_dimension_numbers<[1], [0], [0], [1], [0, 0, 1, 1], [], []>} : vector<4x32xf32>, vector<32x128xf32>, vector<4x128xf32> -> vector<4x128xf32>
    %98 = arith.mulf %97, %97 : vector<4x128xf32>
    %99 = arith.addf %88, %98 : vector<4x128xf32>
    %100 = math.sqrt %99 : vector<4x128xf32>
    %c0_49 = arith.constant 0 : index
    %c0_50 = arith.constant 0 : index
    %101 = vector.load %arg5[%c0_49, %c0_50] : memref<12x128xf32, #tpu.memory_space<vmem>>, vector<4x128xf32>
    tpu.vector_store %arg5[%c0_49, %c0_50], %47 {strides = array<i32>} : memref<12x128xf32, #tpu.memory_space<vmem>>, vector<4x128xf32>,
    %c4_51 = arith.constant 4 : index
    %c0_52 = arith.constant 0 : index
    %102 = vector.load %arg5[%c4_51, %c0_52] : memref<12x128xf32, #tpu.memory_space<vmem>>, vector<4x128xf32>
    tpu.vector_store %arg5[%c4_51, %c0_52], %54 {strides = array<i32>} : memref<12x128xf32, #tpu.memory_space<vmem>>, vector<4x128xf32>,
    %c8_53 = arith.constant 8 : index
    %c0_54 = arith.constant 0 : index
    %103 = vector.load %arg5[%c8_53, %c0_54] : memref<12x128xf32, #tpu.memory_space<vmem>>, vector<4x128xf32>
    tpu.vector_store %arg5[%c8_53, %c0_54], %100 {strides = array<i32>} : memref<12x128xf32, #tpu.memory_space<vmem>>, vector<4x128xf32>,
    return
  }
  func.func @transform_0(%arg0: i32) -> (i32, i32) {
    %c0_i32 = arith.constant 0 : i32
    %c0_i32_0 = arith.constant 0 : i32
    return %c0_i32, %arg0 : i32, i32
  }
  func.func @transform_1(%arg0: i32) -> (i32, i32) {
    %c0_i32 = arith.constant 0 : i32
    %c0_i32_0 = arith.constant 0 : i32
    %c0_i32_1 = arith.constant 0 : i32
    return %c0_i32, %c0_i32_0 : i32, i32
  }
  func.func @transform_2(%arg0: i32) -> (i32, i32) {
    %c0_i32 = arith.constant 0 : i32
    %c0_i32_0 = arith.constant 0 : i32
    %c0_i32_1 = arith.constant 0 : i32
    return %c0_i32, %c0_i32_0 : i32, i32
  }
  func.func @transform_3(%arg0: i32) -> (i32, i32) {
    %c0_i32 = arith.constant 0 : i32
    %c0_i32_0 = arith.constant 0 : i32
    %c0_i32_1 = arith.constant 0 : i32
    return %c0_i32, %c0_i32_0 : i32, i32
  }
  func.func @transform_4(%arg0: i32) -> (i32, i32) {
    %c0_i32 = arith.constant 0 : i32
    %c0_i32_0 = arith.constant 0 : i32
    return %c0_i32, %arg0 : i32, i32
  }
}

</mosaic_0001>

<bundles_post_ra>
// kernel: diffeomorphism_forward.1
= control target key start
LH: loop header
LB: loop body
LE: loop exit
PB: predicated region body
PF: predicated region fallthrough
CT: control target
= control target key end

     0   :  { %vm75_vm0 = vcmask 1043456   ;;  %v2029_v2 = vmov 0.0   ;;  %vm62_vm1 = vcmask 31744   ;;  %v2030_v4 = vmov 0   ;;  %s2490_s0 = inlined_call_operand.vmem [shape: f32[12,128], index: 0, kind: input, shape index: {}]   ;;  %s2491_s2 = inlined_call_operand.vmem [shape: f32[64,4], index: 2, kind: input, shape index: {}]   ;;  %s2492_s3 = inlined_call_operand.vmem [shape: f32[32,4], index: 3, kind: input, shape index: {}]   ;;  %s2493_s1 = inlined_call_operand.vmem [shape: f32[68,32], index: 1, kind: input, shape index: {}]   ;;  %s2494_s4 = inlined_call_operand.vmem [shape: f32[12,128], index: 4, kind: output, shape index: {}]  }
   0x1   :  { %v41_v0 = vld [vmem:[%s2490_s0 + $0x8] sm:$0xf]  ;;  %v39_v1 = vld [vmem:[%s2490_s0] sm:$0xf]  ;;  %146 = vmatprep.mubr.f32.mxu0 %v2029_v2  ;;  %2014 = vset.pattern.permute.xlu1 %v2030_v4  ;;  %v2082_v6 = vld [vmem:[%s2492_s3 + $0x18] sm:$0xff]  ;;  %v2031_v12 = vmov 1  }
   0x2   :  { %v26_v3 = vld [vmem:[%s2491_s2] sm:$0xff]  ;;  %1695 = vmatprep.subr.msk.mxu0 %vm75_vm0, %v41_v0  ;;  %2013 = vset.pattern.permute.xlu0 %v2030_v4  ;;  %v2077_v5 = vld [vmem:[%s2492_s3 + $0x8] sm:$0xff]  ;;  %v2100_v9 = vld [vmem:[%s2492_s3 + $0x10] sm:$0xff]  ;;  %vm187_vm2 = vcmask 261120   ;;  %v2032_v37 = vmov 2   ;;  %vm2033_vm3 = vmmov 0  }
   0x3   :  { %1696 = vmatpush1.msk.msra.mxu0 %vm75_vm0, %v39_v1  ;;  %264 = vmatprep.mubr.f32.mxu1 %v2029_v2  ;;  %v27_v7 = vld [vmem:[%s2491_s2 + $0x8] sm:$0xff]  ;;  %v2094_v8 = vld [vmem:[%s2492_s3] sm:$0xff]  ;;  %v28_v10 = vld [vmem:[%s2491_s2 + $0x10] sm:$0xff] }
   0x4   :  { %1697 = vmatmul.mubr.msk.f32.vlgmr.msra.gmra.mxu0 %vm62_vm1, %v26_v3  ;;  %49 = vperm.xlu1 %2014, %v2077_v5   ;;  %v29_v11 = vld [vmem:[%s2491_s2 + $0x18] sm:$0xff]  ;;  %v2125_v33 = vld [vmem:[%s2493_s1] sm:$0xff]  ;;  %v2133_v34 = vld [vmem:[%s2493_s1 + $0x8] sm:$0xff] }
   0x5   :  { %152 = vmatprep.mubr.f32.mxu0 %v2029_v2  ;;  %59 = vperm.xlu0 %2013, %v2082_v6   ;;  %v2141_v35 = vld [vmem:[%s2493_s1 + $0x10] sm:$0xff]  ;;  %v2149_v36 = vld [vmem:[%s2493_s1 + $0x18] sm:$0xff]  ;;  %v2181_v3 = vld [vmem:[%s2493_s1 + $0x20] sm:$0xff] }
   0x8   :  { %1698 = vmatmul.mubr.msk.f32.gmra.mxu0 %vm62_vm1, %v27_v7  ;;  %44 = vperm.xlu1 %2014, %v2094_v8   ;;  %v2227_v7 = vld [vmem:[%s2491_s2 + $0x30] sm:$0xff] }
   0x9   :  { %158 = vmatprep.mubr.f32.mxu0 %v2029_v2  ;;  %54 = vperm.xlu0 %2013, %v2100_v9  }
   0xc   :  { %1699 = vmatmul.mubr.msk.f32.gmra.mxu0 %vm62_vm1, %v28_v10  ;;  %2016 = vset.pattern.permute.xlu1 %v2031_v12  ;;  %v2244_v10 = vld [vmem:[%s2491_s2 + $0x20] sm:$0xff] }
   0xd   :  { %164 = vmatprep.mubr.f32.mxu0 %v2029_v2  ;;  %2015 = vset.pattern.permute.xlu0 %v2031_v12 }
   0xe   :  { %184 = vperm.xlu0 %2015, %v2082_v6   ;;  %180 = vperm.xlu1 %2016, %v2100_v9  }
  0x10   :  { %1700 = vmatmul.mubr.msk.f32.gmra.mxu0 %vm62_vm1, %v29_v11  ;;  %v2034_v11 = vmov 3  }
  0x11   :  { %389 = vmatprep.mubr.f32.mxu0 %v2029_v2 }
  0x12   :  { %172 = vperm.xlu0 %2015, %v2094_v8   ;;  %176 = vperm.xlu1 %2016, %v2077_v5  }
  0x16   :  { %2017 = vset.pattern.permute.xlu1 %v2032_v37  ;;  %2018 = vset.pattern.permute.xlu0 %v2032_v37 }
  0x17   :  { %310 = vperm.xlu1 %2017, %v2082_v6   ;;  %306 = vperm.xlu0 %2018, %v2100_v9   ;;  %v2215_v6 = vld [vmem:[%s2493_s1 + $0x38] sm:$0xff]  ;;  %v2239_v9 = vld [vmem:[%s2491_s2 + $0x28] sm:$0xff] }
  0x1b   :  { %302 = vperm.xlu1 %2017, %v2077_v5   ;;  %2019 = vset.pattern.permute.xlu0 %v2030_v4  ;;  %v2204_v5 = vld [vmem:[%s2493_s1 + $0x30] sm:$0xff] }
  0x1f   :  { %298 = vperm.xlu1 %2017, %v2094_v8   ;;  %v2232_v8 = vld [vmem:[%s2491_s2 + $0x38] sm:$0xff] }
  0x20   :  { %970 = vperm.xlu0 %2019, %v2232_v8  }
  0x23   :  { %2020 = vset.pattern.permute.xlu1 %v2030_v4  ;;  %v2192_v4 = vld [vmem:[%s2493_s1 + $0x28] sm:$0xff] }
  0x24   :  { %966 = vperm.xlu1 %2020, %v2227_v7   ;;  %958 = vperm.xlu0 %2019, %v2244_v10  }
  0x28   :  { %962 = vperm.xlu1 %2020, %v2239_v9   ;;  %2022 = vset.pattern.permute.xlu0 %v2031_v12 }
  0x29   :  { %1147 = vperm.xlu0 %2022, %v2227_v7  }
  0x2c   :  { %2021 = vset.pattern.permute.xlu1 %v2031_v12  ;;  %v38_v12 = vld [vmem:[%s2492_s3] sm:$0xf] }
  0x2d   :  { %1151 = vperm.xlu1 %2021, %v2232_v8   ;;  %2023 = vset.pattern.permute.xlu0 %v2032_v37 }
  0x2e   :  { %1332 = vperm.xlu0 %2023, %v2232_v8  }
  0x31   :  { %1143 = vperm.xlu1 %2021, %v2239_v9  }
  0x32   :  { %1320 = vperm.xlu0 %2023, %v2244_v10  }
  0x35   :  { %1139 = vperm.xlu1 %2021, %v2244_v10  }
  0x36   :  { %2026 = vset.pattern.permute.xlu0 %v2034_v11 }
  0x37   :  { %1509 = vperm.xlu0 %2026, %v2227_v7  }
  0x39   :  { %2024 = vset.pattern.permute.xlu1 %v2032_v37 }
  0x3a   :  { %1328 = vperm.xlu1 %2024, %v2227_v7  }
  0x3b   :  { %618 = vperm.xlu0 %2026, %v38_v12  }
  0x3e   :  { %1324 = vperm.xlu1 %2024, %v2239_v9  }
  0x42   :  { %2025 = vset.pattern.permute.xlu1 %v2034_v11 }
  0x43   :  { %1513 = vperm.xlu1 %2025, %v2232_v8  }
  0x47   :  { %1505 = vperm.xlu1 %2025, %v2239_v9  }
  0x4b   :  { %1501 = vperm.xlu1 %2025, %v2244_v10  }
  0x7f   :  { %v50_v21 = vpop.permute.xlu1 %49 }
  0x80   :  { %v60_v18 = vpop.permute.xlu0 %59 }
  0x83   :  { %v45_v28 = vpop.permute.xlu1 %44 }
  0x84   :  { %v55_v23 = vpop.permute.xlu0 %54 }
  0x89   :  { %v2162_v43 = vpop.permute.xlu1 %180  ;;  %v2164_v45 = vpop.permute.xlu0 %184 }
  0x8d   :  { %v2167_v49 = vpop.permute.xlu1 %176  ;;  %v2172_v53 = vpop.permute.xlu0 %172 }
  0xc4   :  { %v148_v13 = vpop.f32.mrf.mxu0 }
  0xc5   :  { %v149_v32 = vadd.f32 %v148_v13, %v45_v28 }
  0xc6   :  { %v150_v14 = vpop.f32.mrf.mxu0 }
  0xc7   :  { %v151_v31 = vadd.f32 %v150_v14, %v45_v28  ;;  %v2267_v14 = vpop.permute.xlu1 %310 }
  0xc8   :  { %v154_v15 = vpop.f32.mrf.mxu0 }
  0xc9   :  { %v155_v30 = vadd.f32 %v154_v15, %v50_v21 }
  0xca   :  { %v156_v16 = vpop.f32.mrf.mxu0 }
  0xcb   :  { %v157_v29 = vadd.f32 %v156_v16, %v50_v21 }
  0xcc   :  { %v160_v17 = vpop.f32.mrf.mxu0 }
  0xcd   :  { %v161_v27 = vadd.f32 %v160_v17, %v55_v23 }
  0xce   :  { %v162_v19 = vpop.f32.mrf.mxu0 }
  0xcf   :  { %v163_v26 = vadd.f32 %v162_v19, %v55_v23 }
  0xd0   :  { %v166_v20 = vpop.f32.mrf.mxu0 }
  0xd1   :  { %v167_v25 = vadd.f32 %v166_v20, %v60_v18  ;;  %v2271_v20 = vpop.permute.xlu0 %306 }
  0xd2   :  { %v168_v22 = vpop.f32.mrf.mxu0 }
  0xd3   :  { %v169_v24 = vadd.f32 %v168_v22, %v60_v18  ;;  %v2269_v18 = vpop.permute.xlu1 %302 }
  0xd5   :  { %224 = vmatprep.subr.mxu1 %v169_v24 }
  0xd6   :  { %225 = vmatpush1.msra.mxu1 %v167_v25 }
  0xd7   :  { %226 = vmatprep.subr.mxu1 %v163_v26  ;;  %v2275_v25 = vpop.permute.xlu1 %298 }
  0xd8   :  { %227 = vmatpush1.msra.mxu1 %v161_v27 }
  0xd9   :  { %228 = vmatprep.subr.mxu1 %v157_v29 }
  0xda   :  { %229 = vmatpush1.msra.mxu1 %v155_v30 }
  0xdb   :  { %230 = vmatprep.subr.mxu1 %v151_v31 }
  0xdc   :  { %231 = vmatpush1.msra.mxu1 %v149_v32 }
  0xdd   :  { %1701 = vmatmul.mubr.msk.f32.vlgmr.msra.gmra.mxu1 %vm187_vm2, %v2125_v33 }
  0xde   :  { %270 = vmatprep.mubr.f32.mxu1 %v2029_v2 }
  0xe1   :  { %1702 = vmatmul.mubr.msk.f32.gmra.mxu1 %vm187_vm2, %v2133_v34 }
  0xe2   :  { %276 = vmatprep.mubr.f32.mxu1 %v2029_v2 }
  0xe5   :  { %1703 = vmatmul.mubr.msk.f32.gmra.mxu1 %vm187_vm2, %v2141_v35 }
  0xe6   :  { %282 = vmatprep.mubr.f32.mxu1 %v2029_v2 }
  0xe9   :  { %1704 = vmatmul.mubr.msk.f32.gmra.mxu1 %vm187_vm2, %v2149_v36 }
  0xea   :  { %486 = vmatprep.mubr.f32.mxu1 %v2029_v2 }
 0x19d   :  { %v266_v38 = vpop.f32.mrf.mxu1 }
 0x19e   :  { %v267_v60 = vadd.f32 %v266_v38, %v2172_v53 }
 0x19f   :  { %v268_v39 = vpop.f32.mrf.mxu1 }
 0x1a0   :  { %v269_v58 = vadd.f32 %v268_v39, %v2172_v53  ;;  %v289_v1 = vmax.f32 %v267_v60, 0.0  ;;  %v967_v60 = vpop.permute.xlu1 %966 }
 0x1a1   :  { %v272_v40 = vpop.f32.mrf.mxu1 }
 0x1a2   :  { %v273_v56 = vadd.f32 %v272_v40, %v2167_v49  ;;  %v290_v0 = vmax.f32 %v269_v58, 0.0  ;;  %v2288_v40 = vld [vmem:[%s2493_s1 + $0x40] sm:$0xf] }
 0x1a3   :  { %v274_v41 = vpop.f32.mrf.mxu1 }
 0x1a4   :  { %v275_v54 = vadd.f32 %v274_v41, %v2167_v49  ;;  %v291_v63 = vmax.f32 %v273_v56, 0.0  ;;  %v40_v41 = vld [vmem:[%s2490_s0 + $0x4] sm:$0xf] }
 0x1a5   :  { %v278_v42 = vpop.f32.mrf.mxu1 }
 0x1a6   :  { %v279_v52 = vadd.f32 %v278_v42, %v2162_v43  ;;  %v292_v62 = vmax.f32 %v275_v54, 0.0 }
 0x1a7   :  { %v280_v44 = vpop.f32.mrf.mxu1 }
 0x1a8   :  { %v281_v50 = vadd.f32 %v280_v44, %v2162_v43  ;;  %v293_v61 = vmax.f32 %v279_v52, 0.0  ;;  %v971_v44 = vpop.permute.xlu0 %970 }
 0x1a9   :  { %v284_v46 = vpop.f32.mrf.mxu1 }
 0x1aa   :  { %v285_v47 = vadd.f32 %v284_v46, %v2164_v45  ;;  %v294_v59 = vmax.f32 %v281_v50, 0.0 }
 0x1ab   :  { %v286_v48 = vpop.f32.mrf.mxu1 }
 0x1ac   :  { %v287_v51 = vadd.f32 %v286_v48, %v2164_v45  ;;  %v295_v57 = vmax.f32 %v285_v47, 0.0  ;;  %v2322_v46 = vpop.permute.xlu0 %958 }
 0x1ae   :  { %v296_v55 = vmax.f32 %v287_v51, 0.0 }
 0x1b0   :  { %349 = vmatprep.subr.mxu0 %v296_v55  ;;  %446 = vmatprep.subr.mxu1 %v296_v55  ;;  %v2324_v50 = vpop.permute.xlu0 %1147 }
 0x1b1   :  { %350 = vmatpush1.msra.mxu0 %v295_v57  ;;  %447 = vmatpush1.msra.mxu1 %v295_v57 }
 0x1b2   :  { %351 = vmatprep.subr.mxu0 %v294_v59  ;;  %448 = vmatprep.subr.mxu1 %v294_v59 }
 0x1b3   :  { %352 = vmatpush1.msra.mxu0 %v293_v61  ;;  %449 = vmatpush1.msra.mxu1 %v293_v61 }
 0x1b4   :  { %353 = vmatprep.subr.mxu0 %v292_v62  ;;  %450 = vmatprep.subr.mxu1 %v292_v62  ;;  %v2326_v52 = vpop.permute.xlu0 %1332 }
 0x1b5   :  { %354 = vmatpush1.msra.mxu0 %v291_v63  ;;  %451 = vmatpush1.msra.mxu1 %v291_v63 }
 0x1b6   :  { %355 = vmatprep.subr.mxu0 %v290_v0  ;;  %452 = vmatprep.subr.mxu1 %v290_v0  ;;  %v963_v0 = vpop.permute.xlu1 %962 }
 0x1b7   :  { %356 = vmatpush1.msra.mxu0 %v289_v1  ;;  %453 = vmatpush1.msra.mxu1 %v289_v1 }
 0x1b8   :  { %1705 = vmatmul.mubr.msk.f32.vlgmr.msra.gmra.mxu0 %vm187_vm2, %v2181_v3  ;;  %1709 = vmatmul.mubr.msk.f32.vlgmr.msra.gmra.mxu1 %vm187_vm2, %v2125_v33  ;;  %v2328_v56 = vpop.permute.xlu0 %1320 }
 0x1b9   :  { %395 = vmatprep.mubr.f32.mxu0 %v2029_v2  ;;  %492 = vmatprep.mubr.f32.mxu1 %v2029_v2 }
 0x1ba   :  { %1863 = vmatprep.subr.mxu1 %v2029_v2  ;;  %v1152_v12 = vpop.permute.xlu1 %1151 }
 0x1bc   :  { %1706 = vmatmul.mubr.msk.f32.gmra.mxu0 %vm187_vm2, %v2192_v4  ;;  %1710 = vmatmul.mubr.msk.f32.gmra.mxu1 %vm187_vm2, %v2133_v34  ;;  %v2330_v58 = vpop.permute.xlu0 %1509 }
 0x1bd   :  { %401 = vmatprep.mubr.f32.mxu0 %v2029_v2  ;;  %498 = vmatprep.mubr.f32.mxu1 %v2029_v2 }
 0x1c0   :  { %1707 = vmatmul.mubr.msk.f32.gmra.mxu0 %vm187_vm2, %v2204_v5  ;;  %1711 = vmatmul.mubr.msk.f32.gmra.mxu1 %vm187_vm2, %v2141_v35  ;;  %v619_v62 = vpop.permute.xlu0 %618 }
 0x1c1   :  { %407 = vmatprep.mubr.f32.mxu0 %v2029_v2  ;;  %504 = vmatprep.mubr.f32.mxu1 %v2029_v2 }
 0x1c4   :  { %1708 = vmatmul.mubr.msk.f32.gmra.mxu0 %vm187_vm2, %v2215_v6  ;;  %1712 = vmatmul.mubr.msk.f32.gmra.mxu1 %vm187_vm2, %v2149_v36 }
 0x1c5   :  { %575 = vmatprep.mubr.f32.mxu0 %v2029_v2  ;;  %1871 = vmatprep.mubr.msk.f32.mxu1 %vm2033_vm3, %v2029_v2 }
 0x278   :  { %v391_v13 = vpop.f32.mrf.mxu0  ;;  %v488_v47 = vpop.f32.mrf.mxu1 }
 0x279   :  { %v392_v31 = vadd.f32 %v391_v13, %v2275_v25 }
 0x27a   :  { %v393_v15 = vpop.f32.mrf.mxu0  ;;  %v490_v48 = vpop.f32.mrf.mxu1 }
 0x27b   :  { %v394_v35 = vadd.f32 %v393_v15, %v2275_v25  ;;  %v414_v38 = vmax.f32 %v392_v31, 0.0 }
 0x27c   :  { %v397_v16 = vpop.f32.mrf.mxu0  ;;  %v494_v51 = vpop.f32.mrf.mxu1 }
 0x27d   :  { %v398_v27 = vadd.f32 %v397_v16, %v2269_v18  ;;  %v415_v42 = vmax.f32 %v394_v35, 0.0  ;;  %v495_v13 = vadd.f32 %v494_v51, %v2167_v49  ;;  %v489_v16 = vadd.f32 %v488_v47, %v2172_v53 }
 0x27e   :  { %v399_v17 = vpop.f32.mrf.mxu0  ;;  %v496_v54 = vpop.f32.mrf.mxu1 }
 0x27f   :  { %v400_v32 = vadd.f32 %v399_v17, %v2269_v18  ;;  %v416_v36 = vmax.f32 %v398_v27, 0.0  ;;  %vm601_vm6 = vcmp.gt.f32.partialorder %v495_v13, 0.0  ;;  %vm600_vm7 = vcmp.gt.f32.partialorder %v489_v16, 0.0 }
 0x280   :  { %v403_v19 = vpop.f32.mrf.mxu0  ;;  %v500_v55 = vpop.f32.mrf.mxu1 }
 0x281   :  { %v404_v23 = vadd.f32 %v403_v19, %v2271_v20  ;;  %v417_v39 = vmax.f32 %v400_v32, 0.0 }
 0x282   :  { %v405_v21 = vpop.f32.mrf.mxu0  ;;  %v502_v57 = vpop.f32.mrf.mxu1 }
 0x283   :  { %v406_v28 = vadd.f32 %v405_v21, %v2271_v20  ;;  %v418_v33 = vmax.f32 %v404_v23, 0.0  ;;  %v1144_v21 = vpop.permute.xlu1 %1143  ;;  %v497_v23 = vadd.f32 %v496_v54, %v2167_v49 }
 0x284   :  { %v409_v22 = vpop.f32.mrf.mxu0  ;;  %v506_v59 = vpop.f32.mrf.mxu1 }
 0x285   :  { %v410_v24 = vadd.f32 %v409_v22, %v2267_v14  ;;  %v419_v37 = vmax.f32 %v406_v28, 0.0  ;;  %v503_v22 = vadd.f32 %v502_v57, %v2162_v43  ;;  %vm605_vm10 = vcmp.gt.f32.partialorder %v497_v23, 0.0 }
 0x286   :  { %v411_v26 = vpop.f32.mrf.mxu0  ;;  %v508_v61 = vpop.f32.mrf.mxu1 }
 0x287   :  { %v420_v29 = vmax.f32 %v410_v24, 0.0  ;;  %v412_v30 = vadd.f32 %v411_v26, %v2267_v14  ;;  %v509_v19 = vadd.f32 %v508_v61, %v2164_v45  ;;  %v491_v24 = vadd.f32 %v490_v48, %v2172_v53 }
 0x288   :  { %vm606_vm9 = vcmp.gt.f32.partialorder %v503_v22, 0.0 }
 0x289   :  { %v421_v34 = vmax.f32 %v412_v30, 0.0  ;;  %1864 = vmatpush3.msra.mxu1 %v420_v29  ;;  %vm607_vm8 = vcmp.gt.f32.partialorder %v509_v19, 0.0  ;;  %vm604_vm11 = vcmp.gt.f32.partialorder %v491_v24, 0.0 }
 0x28a   :  { %1865 = vmatprep.subr.mxu1 %v2029_v2 }
 0x28b   :  { %535 = vmatprep.subr.mxu0 %v421_v34  ;;  %1866 = vmatpush3.msra.mxu1 %v418_v33 }
 0x28c   :  { %536 = vmatpush1.msra.mxu0 %v420_v29  ;;  %1867 = vmatprep.subr.mxu1 %v2029_v2 }
 0x28d   :  { %537 = vmatprep.subr.mxu0 %v419_v37  ;;  %1868 = vmatpush3.msra.mxu1 %v416_v36 }
 0x28e   :  { %538 = vmatpush1.msra.mxu0 %v418_v33  ;;  %1869 = vmatprep.subr.mxu1 %v2029_v2 }
 0x28f   :  { %539 = vmatprep.subr.mxu0 %v417_v39  ;;  %1870 = vmatpush3.msra.mxu1 %v414_v38 }
 0x290   :  { %540 = vmatpush1.msra.mxu0 %v416_v36  ;;  %1872 = vmatmul.mubr.msk.f32.vlgmr.msra.gmra.mxu1 %vm187_vm2, %v2288_v40 }
 0x291   :  { %541 = vmatprep.subr.mxu0 %v415_v42  ;;  %1874 = vmatprep.subr.msk.mxu1 %vm75_vm0, %v40_v41 }
 0x292   :  { %542 = vmatpush1.msra.mxu0 %v414_v38  ;;  %1875 = vmatpush3.msk.msra.mxu1 %vm75_vm0, %v40_v41 }
 0x293   :  { %1713 = vmatmul.mubr.msk.f32.vlgmr.msra.gmra.mxu0 %vm187_vm2, %v2181_v3  ;;  %1876 = vmatprep.mubr.msk.f32.mxu1 %vm62_vm1, %v2244_v10  ;;  %v501_v10 = vadd.f32 %v500_v55, %v2162_v43  ;;  %v1140_v43 = vpop.permute.xlu1 %1139 }
 0x294   :  { %1877 = vmatmul.mubr.msk.f32.vlgmr.msra.gmra.mxu1 %vm62_vm1, %v2239_v9  ;;  %581 = vmatprep.mubr.f32.mxu0 %v2029_v2 }
 0x295   :  { %1879 = vmatprep.mubr.msk.f32.mxu1 %vm62_vm1, %v2227_v7  ;;  %1896 = vmatprep.subr.mxu1 %v2029_v2  ;;  %vm602_vm5 = vcmp.gt.f32.partialorder %v501_v10, 0.0 }
 0x297   :  { %1714 = vmatmul.mubr.msk.f32.gmra.mxu0 %vm187_vm2, %v2192_v4 }
 0x298   :  { %1880 = vmatmul.mubr.msk.f32.gmra.mxu1 %vm62_vm1, %v2232_v8  ;;  %587 = vmatprep.mubr.f32.mxu0 %v2029_v2  ;;  %v507_v8 = vadd.f32 %v506_v59, %v2164_v45  ;;  %v1329_v45 = vpop.permute.xlu1 %1328 }
 0x299   :  { %1904 = vmatprep.mubr.msk.f32.mxu1 %vm2033_vm3, %v2029_v2 }
 0x29a   :  { %vm603_vm4 = vcmp.gt.f32.partialorder %v507_v8, 0.0 }
 0x29b   :  { %1715 = vmatmul.mubr.msk.f32.gmra.mxu0 %vm187_vm2, %v2204_v5 }
 0x29c   :  { %593 = vmatprep.mubr.f32.mxu0 %v2029_v2  ;;  %v1325_v49 = vpop.permute.xlu1 %1324 }
 0x29f   :  { %1716 = vmatmul.mubr.msk.f32.gmra.mxu0 %vm187_vm2, %v2215_v6 }
 0x2a0   :  { %1890 = vmatprep.mubr.msk.f32.mxu0 %vm187_vm2, %v2181_v3  ;;  %v1514_v53 = vpop.permute.xlu1 %1513 }
 0x2a4   :  { %v1506_v26 = vpop.permute.xlu1 %1505 }
 0x2a8   :  { %v1502_v27 = vpop.permute.xlu1 %1501 }
 0x350   :  { %v690_v63 = vpop.f32.mrf.mxu1 }
 0x351   :  { %v691_v1 = vadd.f32 %v690_v63, %v619_v62 }
 0x352   :  { %v1873_v7 = vpop.f32.mrf.mxu1 }
 0x353   :  { %1688 = vst [vmem:[%s2494_s4] sm:$0xf] %v691_v1  ;;  %v577_v28 = vpop.f32.mrf.mxu0 }
 0x354   :  { %v1878_v9 = vpop.f32.mrf.mxu1 }
 0x355   :  { %v579_v29 = vpop.f32.mrf.mxu0 }
 0x356   :  { %v775_v11 = vpop.f32.mrf.mxu1 }
 0x357   :  { %v583_v30 = vpop.f32.mrf.mxu0 }
 0x358   :  { %v1881_v15 = vpop.f32.mrf.mxu1  ;;  %v584_v38 = vadd.f32 %v583_v30, %v2269_v18 }
 0x359   :  { %1882 = vmatprep.subr.msk.mxu0 %vm603_vm4, %v1881_v15  ;;  %v585_v31 = vpop.f32.mrf.mxu0 }
 0x35a   :  { %v785_v17 = vpop.f32.mrf.mxu1  ;;  %1883 = vmatpush3.msk.msra.mxu0 %vm603_vm4, %v1881_v15  ;;  %vm609_vm14 = vcmp.gt.f32.partialorder %v584_v38, 0.0  ;;  %v586_v47 = vadd.f32 %v585_v31, %v2269_v18 }
 0x35b   :  { %1884 = vmatprep.subr.msk.mxu0 %vm602_vm5, %v785_v17  ;;  %v589_v32 = vpop.f32.mrf.mxu0 }
 0x35c   :  { %1885 = vmatpush3.msk.msra.mxu0 %vm602_vm5, %v785_v17  ;;  %v590_v37 = vadd.f32 %v589_v32, %v2271_v20  ;;  %vm613_vm4 = vcmp.gt.f32.partialorder %v586_v47, 0.0 }
 0x35d   :  { %1886 = vmatprep.subr.msk.mxu0 %vm601_vm6, %v1878_v9  ;;  %v591_v33 = vpop.f32.mrf.mxu0 }
 0x35e   :  { %1887 = vmatpush3.msk.msra.mxu0 %vm601_vm6, %v1878_v9  ;;  %vm610_vm13 = vcmp.gt.f32.partialorder %v590_v37, 0.0 }
 0x35f   :  { %1888 = vmatprep.subr.msk.mxu0 %vm600_vm7, %v775_v11 }
 0x360   :  { %1889 = vmatpush3.msk.msra.mxu0 %vm600_vm7, %v775_v11 }
 0x361   :  { %1891 = vmatmul.mubr.msk.f32.vlgmr.msra.gmra.mxu0 %vm187_vm2, %v2192_v4  ;;  %1907 = vmatprep.subr.msk.mxu0 %vm607_vm8, %v971_v44 }
 0x362   :  { %1908 = vmatpush3.msk.msra.mxu0 %vm607_vm8, %v971_v44  ;;  %1893 = vmatprep.mubr.msk.f32.mxu0 %vm187_vm2, %v2204_v5  ;;  %v592_v44 = vadd.f32 %v591_v33, %v2271_v20 }
 0x363   :  { %1909 = vmatprep.subr.msk.mxu0 %vm606_vm9, %v967_v60 }
 0x364   :  { %1910 = vmatpush3.msk.msra.mxu0 %vm606_vm9, %v967_v60  ;;  %vm614_vm1 = vcmp.gt.f32.partialorder %v592_v44, 0.0 }
 0x365   :  { %1894 = vmatmul.mubr.msk.f32.gmra.mxu0 %vm187_vm2, %v2215_v6  ;;  %1911 = vmatprep.subr.msk.mxu0 %vm605_vm10, %v963_v0 }
 0x366   :  { %1912 = vmatpush3.msk.msra.mxu0 %vm605_vm10, %v963_v0  ;;  %1915 = vmatprep.mubr.msk.f32.mxu0 %vm187_vm2, %v2181_v3 }
 0x367   :  { %1913 = vmatprep.subr.msk.mxu0 %vm604_vm11, %v2322_v46 }
 0x368   :  { %1914 = vmatpush3.msk.msra.mxu0 %vm604_vm11, %v2322_v46 }
 0x369   :  { %1916 = vmatmul.mubr.msk.f32.vlgmr.msra.gmra.mxu0 %vm187_vm2, %v2192_v4  ;;  %1932 = vmatprep.subr.msk.mxu0 %vm607_vm8, %v1152_v12 }
 0x36a   :  { %1933 = vmatpush3.msk.msra.mxu0 %vm607_vm8, %v1152_v12  ;;  %1918 = vmatprep.mubr.msk.f32.mxu0 %vm187_vm2, %v2204_v5 }
 0x36b   :  { %1934 = vmatprep.subr.msk.mxu0 %vm606_vm9, %v2324_v50 }
 0x36c   :  { %1935 = vmatpush3.msk.msra.mxu0 %vm606_vm9, %v2324_v50 }
 0x36d   :  { %1919 = vmatmul.mubr.msk.f32.gmra.mxu0 %vm187_vm2, %v2215_v6  ;;  %1936 = vmatprep.subr.msk.mxu0 %vm605_vm10, %v1144_v21 }
 0x36e   :  { %1937 = vmatpush3.msk.msra.mxu0 %vm605_vm10, %v1144_v21  ;;  %1940 = vmatprep.mubr.msk.f32.mxu0 %vm187_vm2, %v2181_v3 }
 0x36f   :  { %1938 = vmatprep.subr.msk.mxu0 %vm604_vm11, %v1140_v43 }
 0x370   :  { %1939 = vmatpush3.msk.msra.mxu0 %vm604_vm11, %v1140_v43 }
 0x371   :  { %1941 = vmatmul.mubr.msk.f32.vlgmr.msra.gmra.mxu0 %vm187_vm2, %v2192_v4  ;;  %1957 = vmatprep.subr.msk.mxu0 %vm607_vm8, %v2326_v52 }
 0x372   :  { %1958 = vmatpush3.msk.msra.mxu0 %vm607_vm8, %v2326_v52  ;;  %1943 = vmatprep.mubr.msk.f32.mxu0 %vm187_vm2, %v2204_v5 }
 0x373   :  { %1959 = vmatprep.subr.msk.mxu0 %vm606_vm9, %v1329_v45 }
 0x374   :  { %1960 = vmatpush3.msk.msra.mxu0 %vm606_vm9, %v1329_v45 }
 0x375   :  { %1944 = vmatmul.mubr.msk.f32.gmra.mxu0 %vm187_vm2, %v2215_v6  ;;  %1961 = vmatprep.subr.msk.mxu0 %vm605_vm10, %v1325_v49 }
 0x376   :  { %1962 = vmatpush3.msk.msra.mxu0 %vm605_vm10, %v1325_v49  ;;  %1965 = vmatprep.mubr.msk.f32.mxu0 %vm187_vm2, %v2181_v3 }
 0x377   :  { %1963 = vmatprep.subr.msk.mxu0 %vm604_vm11, %v2328_v56 }
 0x378   :  { %1964 = vmatpush3.msk.msra.mxu0 %vm604_vm11, %v2328_v56 }
 0x379   :  { %1966 = vmatmul.mubr.msk.f32.vlgmr.msra.gmra.mxu0 %vm187_vm2, %v2192_v4  ;;  %1982 = vmatprep.subr.msk.mxu0 %vm607_vm8, %v1514_v53 }
 0x37a   :  { %1983 = vmatpush3.msk.msra.mxu0 %vm607_vm8, %v1514_v53  ;;  %1968 = vmatprep.mubr.msk.f32.mxu0 %vm187_vm2, %v2204_v5 }
 0x37b   :  { %1984 = vmatprep.subr.msk.mxu0 %vm606_vm9, %v2330_v58 }
 0x37c   :  { %1985 = vmatpush3.msk.msra.mxu0 %vm606_vm9, %v2330_v58 }
 0x37d   :  { %1969 = vmatmul.mubr.msk.f32.gmra.mxu0 %vm187_vm2, %v2215_v6  ;;  %1986 = vmatprep.subr.msk.mxu0 %vm605_vm10, %v1506_v26 }
 0x37e   :  { %1987 = vmatpush3.msk.msra.mxu0 %vm605_vm10, %v1506_v26  ;;  %1990 = vmatprep.mubr.msk.f32.mxu0 %vm187_vm2, %v2181_v3  ;;  %v595_v3 = vpop.f32.mrf.mxu0 }
 0x37f   :  { %1988 = vmatprep.subr.msk.mxu0 %vm604_vm11, %v1502_v27  ;;  %v596_v35 = vadd.f32 %v595_v3, %v2267_v14 }
 0x380   :  { %1989 = vmatpush3.msk.msra.mxu0 %vm604_vm11, %v1502_v27  ;;  %v597_v34 = vpop.f32.mrf.mxu0 }
 0x381   :  { %1991 = vmatmul.mubr.msk.f32.vlgmr.msra.gmra.mxu0 %vm187_vm2, %v2192_v4  ;;  %vm611_vm12 = vcmp.gt.f32.partialorder %v596_v35, 0.0  ;;  %v598_v41 = vadd.f32 %v597_v34, %v2267_v14  ;;  %v580_v14 = vadd.f32 %v579_v29, %v2275_v25 }
 0x382   :  { %1993 = vmatprep.mubr.msk.f32.mxu0 %vm187_vm2, %v2204_v5 }
 0x383   :  { %vm615_vm0 = vcmp.gt.f32.partialorder %v598_v41, 0.0  ;;  %vm612_vm5 = vcmp.gt.f32.partialorder %v580_v14, 0.0 }
 0x385   :  { %1994 = vmatmul.mubr.msk.f32.gmra.mxu0 %vm187_vm2, %v2215_v6  ;;  %v578_v6 = vadd.f32 %v577_v28, %v2275_v25 }
 0x387   :  { %vm608_vm15 = vcmp.gt.f32.partialorder %v578_v6, 0.0 }
 0x421   :  { %v1892_v36 = vpop.f32.mrf.mxu0 }
 0x423   :  { %v864_v4 = vpop.f32.mrf.mxu0 }
 0x425   :  { %v1895_v5 = vpop.f32.mrf.mxu0 }
 0x426   :  { %1897 = vmatpush3.msk.msra.mxu1 %vm611_vm12, %v1895_v5 }
 0x427   :  { %v874_v39 = vpop.f32.mrf.mxu0  ;;  %1898 = vmatprep.subr.mxu1 %v2029_v2 }
 0x428   :  { %1899 = vmatpush3.msk.msra.mxu1 %vm610_vm13, %v874_v39 }
 0x429   :  { %1900 = vmatprep.subr.mxu1 %v2029_v2  ;;  %v1917_v42 = vpop.f32.mrf.mxu0 }
 0x42a   :  { %1901 = vmatpush3.msk.msra.mxu1 %vm609_vm14, %v1892_v36 }
 0x42b   :  { %1902 = vmatprep.subr.mxu1 %v2029_v2  ;;  %v1043_v46 = vpop.f32.mrf.mxu0 }
 0x42c   :  { %1903 = vmatpush3.msk.msra.mxu1 %vm608_vm15, %v864_v4 }
 0x42d   :  { %v1920_v48 = vpop.f32.mrf.mxu0  ;;  %1921 = vmatprep.subr.mxu1 %v2029_v2  ;;  %1905 = vmatmul.mubr.msk.f32.vlgmr.msra.gmra.mxu1 %vm187_vm2, %v2288_v40 }
 0x42e   :  { %1922 = vmatpush3.msk.msra.mxu1 %vm615_vm0, %v1920_v48  ;;  %1929 = vmatprep.mubr.msk.f32.mxu1 %vm2033_vm3, %v2029_v2 }
 0x42f   :  { %v1053_v20 = vpop.f32.mrf.mxu0  ;;  %1923 = vmatprep.subr.mxu1 %v2029_v2 }
 0x430   :  { %1924 = vmatpush3.msk.msra.mxu1 %vm614_vm1, %v1053_v20 }
 0x431   :  { %1925 = vmatprep.subr.mxu1 %v2029_v2  ;;  %v1942_v18 = vpop.f32.mrf.mxu0 }
 0x432   :  { %1926 = vmatpush3.msk.msra.mxu1 %vm613_vm4, %v1917_v42 }
 0x433   :  { %1927 = vmatprep.subr.mxu1 %v2029_v2  ;;  %v1224_v50 = vpop.f32.mrf.mxu0 }
 0x434   :  { %1928 = vmatpush3.msk.msra.mxu1 %vm612_vm5, %v1043_v46 }
 0x435   :  { %v1945_v51 = vpop.f32.mrf.mxu0  ;;  %1946 = vmatprep.subr.mxu1 %v2029_v2  ;;  %1930 = vmatmul.mubr.msk.f32.vlgmr.msra.gmra.mxu1 %vm187_vm2, %v2288_v40 }
 0x436   :  { %1947 = vmatpush3.msk.msra.mxu1 %vm615_vm0, %v1945_v51  ;;  %1954 = vmatprep.mubr.msk.f32.mxu1 %vm2033_vm3, %v2029_v2 }
 0x437   :  { %v1234_v25 = vpop.f32.mrf.mxu0  ;;  %1948 = vmatprep.subr.mxu1 %v2029_v2 }
 0x438   :  { %1949 = vmatpush3.msk.msra.mxu1 %vm614_vm1, %v1234_v25 }
 0x439   :  { %1950 = vmatprep.subr.mxu1 %v2029_v2  ;;  %v1967_v52 = vpop.f32.mrf.mxu0 }
 0x43a   :  { %1951 = vmatpush3.msk.msra.mxu1 %vm613_vm4, %v1942_v18 }
 0x43b   :  { %1952 = vmatprep.subr.mxu1 %v2029_v2  ;;  %v1405_v54 = vpop.f32.mrf.mxu0 }
 0x43c   :  { %1953 = vmatpush3.msk.msra.mxu1 %vm612_vm5, %v1224_v50 }
 0x43d   :  { %v1970_v55 = vpop.f32.mrf.mxu0  ;;  %1971 = vmatprep.subr.mxu1 %v2029_v2  ;;  %1955 = vmatmul.mubr.msk.f32.vlgmr.msra.gmra.mxu1 %vm187_vm2, %v2288_v40 }
 0x43e   :  { %1972 = vmatpush3.msk.msra.mxu1 %vm615_vm0, %v1970_v55  ;;  %1979 = vmatprep.mubr.msk.f32.mxu1 %vm2033_vm3, %v2029_v2 }
 0x43f   :  { %v1415_v56 = vpop.f32.mrf.mxu0  ;;  %1973 = vmatprep.subr.mxu1 %v2029_v2 }
 0x440   :  { %1974 = vmatpush3.msk.msra.mxu1 %vm614_vm1, %v1415_v56 }
 0x441   :  { %1975 = vmatprep.subr.mxu1 %v2029_v2  ;;  %v1992_v57 = vpop.f32.mrf.mxu0 }
 0x442   :  { %1976 = vmatpush3.msk.msra.mxu1 %vm613_vm4, %v1967_v52 }
 0x443   :  { %1977 = vmatprep.subr.mxu1 %v2029_v2  ;;  %v1586_v58 = vpop.f32.mrf.mxu0 }
 0x444   :  { %1978 = vmatpush3.msk.msra.mxu1 %vm612_vm5, %v1405_v54 }
 0x445   :  { %1980 = vmatmul.mubr.msk.f32.vlgmr.msra.gmra.mxu1 %vm187_vm2, %v2288_v40  ;;  %v1995_v59 = vpop.f32.mrf.mxu0  ;;  %1996 = vmatprep.subr.mxu1 %v2029_v2 }
 0x446   :  { %1997 = vmatpush3.msk.msra.mxu1 %vm615_vm0, %v1995_v59  ;;  %2004 = vmatprep.mubr.msk.f32.mxu1 %vm2033_vm3, %v2029_v2 }
 0x447   :  { %v1596_v60 = vpop.f32.mrf.mxu0  ;;  %1998 = vmatprep.subr.mxu1 %v2029_v2 }
 0x448   :  { %1999 = vmatpush3.msk.msra.mxu1 %vm614_vm1, %v1596_v60 }
 0x449   :  { %2000 = vmatprep.subr.mxu1 %v2029_v2 }
 0x44a   :  { %2001 = vmatpush3.msk.msra.mxu1 %vm613_vm4, %v1992_v57 }
 0x44b   :  { %2002 = vmatprep.subr.mxu1 %v2029_v2 }
 0x44c   :  { %2003 = vmatpush3.msk.msra.mxu1 %vm612_vm5, %v1586_v58 }
 0x44d   :  { %2005 = vmatmul.mubr.msk.f32.vlgmr.msra.gmra.mxu1 %vm187_vm2, %v2288_v40 }
 0x4ed   :  { %v953_v61 = vpop.f32.mrf.mxu1 }
 0x4ee   :  { %1689 = vst [vmem:[%s2494_s4 + $0x4] sm:$0xf] %v953_v61 }
 0x4ef   :  { %v1906_v62 = vpop.f32.mrf.mxu1 }
 0x4f5   :  { %v1132_v63 = vpop.f32.mrf.mxu1 }
 0x4f6   :  { %v1136_v11 = vmul.f32 %v1132_v63, %v1132_v63 }
 0x4f7   :  { %v1931_v0 = vpop.f32.mrf.mxu1 }
 0x4fd   :  { %v1313_v1 = vpop.f32.mrf.mxu1 }
 0x4fe   :  { %v1317_v10 = vmul.f32 %v1313_v1, %v1313_v1 }
 0x4ff   :  { %v1956_v7 = vpop.f32.mrf.mxu1 }
 0x500   :  { %v1318_v12 = vadd.f32 %v1317_v10, %v1136_v11 }
 0x505   :  { %v1494_v8 = vpop.f32.mrf.mxu1 }
 0x506   :  { %v1498_v2 = vmul.f32 %v1494_v8, %v1494_v8 }
 0x507   :  { %v1981_v9 = vpop.f32.mrf.mxu1 }
 0x508   :  { %v1499_v15 = vadd.f32 %v1498_v2, %v1318_v12 }
 0x50d   :  { %v1675_v13 = vpop.f32.mrf.mxu1 }
 0x50e   :  { %v1679_v16 = vmul.f32 %v1675_v13, %v1675_v13 }
 0x50f   :  { %v2006_v40 = vpop.f32.mrf.mxu1 }
 0x510   :  { %v1680_v17 = vadd.f32 %v1679_v16, %v1499_v15 }
 0x512   :  { %2027 = vrsqrt.f32 %v1680_v17  ;;  %vm1683_vm2 = vcmp.eq.f32.partialorder %v1680_v17, inf  ;;  %v1686_v22 = vand.u32 2147483648, %v1680_v17  ;;  %vm1685_vm3 = vcmp.eq.f32.partialorder %v1680_v17, 0.0 }
 0x51f   :  { %v2028_v19 = vpop.eup %2027 }
 0x520   :  { %v1682_v21 = vmul.f32 %v2028_v19, %v1680_v17 }
 0x522   :  { %v1684_v23 = vsel %vm1683_vm2, %v1680_v17, %v1682_v21 }
 0x523   :  { %v1687_v24 = vsel %vm1685_vm3, %v1686_v22, %v1684_v23 }
 0x524   :  { %1690 = vst [vmem:[%s2494_s4 + $0x8] sm:$0xf] %v1687_v24 }

</bundles_post_ra>
